<compile_context>
chip_gen: v6e
topology: v6e:2x2x1
jax: 0.10.0
libtpu: 0.0.40
codegen_flags: <defaults>
</compile_context>

<pallas_src>
import math

import jax
import jax.numpy as jnp
from jax.experimental import pallas as pl
from jax.experimental.pallas import tpu as pltpu


def _make_encoder_kernel(n_layers):
    """Kernel for an MLP with `n_layers` Linear layers (ReLU between them).

    Column layout: every activation is (features, TB*d) with columns indexed by
    (local_batch * d + node).  rest = (W0, b0, ..., W_{L-2}, b_{L-2}, W_last, out_ref):
    hidden layers carry (out,in) weight + (out,1) bias; the last layer's bias and the
    Wa terms are folded into c_ref by the wrapper.
    """

    def kernel(x_ref, m_ref, c_ref, *rest):
        param_refs = rest[:-1]
        o_ref = rest[-1]

        h = x_ref[...]                                            # (n_xdims, TB*d)
        for i in range(n_layers - 1):
            w = param_refs[2 * i][...]                            # (out, in) - native layout
            b = param_refs[2 * i + 1][...]                        # (out, 1)  - lane broadcast
            h = jnp.maximum(
                jnp.dot(w, h, preferred_element_type=jnp.float32) + b, 0.0)

        w_last = param_refs[-1][...]                              # (n_out, hidden)
        z = jnp.dot(w_last, h, preferred_element_type=jnp.float32)  # (n_out, TB*d)

        # Per-sample (I - A^T) multiply == right-multiply by kron(I_TB, adj_norm^T);
        # Wa / b_last terms are already folded into c_ref.
        o_ref[...] = (jnp.dot(z, m_ref[...], preferred_element_type=jnp.float32)
                      + c_ref[...]).astype(o_ref.dtype)

    return kernel


def _round_up(x, m):
    return ((x + m - 1) // m) * m


def mlp_encoder_forward(inputs, A, Wa, weights, biases, *, tile_b=None):
    """Pallas-backed forward of MLPEncoder.

    inputs : (B, d, n_xdims) float32
    A      : (d, d)  float32      (plays the role of adj_A passed to forward)
    Wa     : (n_out,) float32
    weights: list of (out_i, in_i) float32 (nn.Linear convention)
    biases : list of (out_i,) float32
    """
    f32 = jnp.float32
    B, d, n_xdims = inputs.shape
    n_layers = len(weights)
    n_out = weights[-1].shape[0]

    # --- batch tile selection: TB*d columns per step, multiple of 128 when possible ---
    if tile_b is None:
        lane_mult = max(1, 128 // math.gcd(128, d))   # smallest TB making TB*d % 128 == 0
        tb = max(1, 256 // d)                         # ~256 lane-dense columns per step
        tb = _round_up(tb, lane_mult)
        tile_b = min(tb, _round_up(B, lane_mult))     # don't over-pad tiny batches
    grid_b = pl.cdiv(B, tile_b)
    B_pad = grid_b * tile_b
    cols = tile_b * d

    # --- pad batch and move to column layout: x_cols[f, b*d + i] = inputs[b, i, f] ---
    x = inputs.astype(f32)
    if B_pad != B:
        x = jnp.pad(x, ((0, B_pad - B), (0, 0), (0, 0)))
    x_cols = x.reshape(B_pad * d, n_xdims).T                     # (n_xdims, B_pad*d)

    # --- hoisted per-call constants (computed once in plain JAX) ---
    A = A.astype(f32)
    adj_norm = jnp.eye(d, dtype=f32) - A.T                       # (d, d)
    m_kron = jnp.kron(jnp.eye(tile_b, dtype=f32), adj_norm.T)    # (TB*d, TB*d)
    wa = Wa.astype(f32)
    b_last = biases[-1].astype(f32)
    r = adj_norm.sum(axis=1)                                     # rowsum(I - A^T)
    c = r[:, None] * (b_last + wa)[None, :] - wa[None, :]        # (d, n_out)
    c_cols = jnp.tile(c.T, (1, tile_b))                          # (n_out, TB*d)

    # --- parameters: hidden layers (W, b-as-column), last layer W only (bias folded) ---
    params = []
    for i in range(n_layers - 1):
        params.append(weights[i].astype(f32))                    # (out, in)
        params.append(biases[i].astype(f32).reshape(-1, 1))      # (out, 1)
    params.append(weights[-1].astype(f32))                       # (n_out, hidden)

    def _const_spec(shape):
        return pl.BlockSpec(shape, lambda g: tuple(0 for _ in shape))

    in_specs = [
        pl.BlockSpec((n_xdims, cols), lambda g: (0, g)),         # streamed input tile
        _const_spec(m_kron.shape),                               # resident kron adjacency
        _const_spec(c_cols.shape),                               # resident additive const
    ]
    in_specs += [_const_spec(p.shape) for p in params]           # resident weights/biases
    out_spec = pl.BlockSpec((n_out, cols), lambda g: (0, g))     # lane-dense output slab

    out_cols = pl.pallas_call(
        _make_encoder_kernel(n_layers),
        out_shape=jax.ShapeDtypeStruct((n_out, B_pad * d), f32),
        grid_spec=pltpu.PrefetchScalarGridSpec(
            num_scalar_prefetch=0,
            grid=(grid_b,),
            in_specs=in_specs,
            out_specs=out_spec,
        ),
        compiler_params=pltpu.CompilerParams(
            dimension_semantics=("parallel",),
            vmem_limit_bytes=32 * 1024 * 1024,   # ample headroom; actual use is ~1-2 MiB
        ),
    )(x_cols, m_kron, c_cols, *params)

    # column layout -> (B, d, n_out); out_cols[k, b*d + i] = logits[b, i, k]
    logits = out_cols.T.reshape(B_pad, d, n_out)[:B]
    return logits


def _xavier_normal(key, out_f, in_f):
    std = math.sqrt(2.0 / (in_f + out_f))
    return jax.random.normal(key, (out_f, in_f), dtype=jnp.float32) * std


def _reference_forward(inputs, A, Wa, weights, biases):
    """Pure-JAX reference matching the PyTorch semantics."""
    d = A.shape[0]
    x = inputs
    for i, (w, b) in enumerate(zip(weights, biases)):
        x = x @ w.T + b
        if i < len(weights) - 1:
            x = jnp.maximum(x, 0.0)
    adj_norm = jnp.eye(d, dtype=jnp.float32) - A.T
    return jnp.einsum("ij,bjk->bik", adj_norm, x + Wa) - Wa


if __name__ == "__main__":
    # Small but tiling-relevant problem: B=64, TB=32 -> 2 grid steps, 256 lane-dense cols.
    B, d = 64, 8                # batch, number of graph nodes
    n_xdims = 4                 # per-node input feature dim
    hidden_layers = [32]        # single hidden layer
    n_out = 4

    key = jax.random.PRNGKey(0)
    k_in, k_a, k_wa, k_w0, k_w1, k_b0, k_b1 = jax.random.split(key, 7)

    inputs = jax.random.normal(k_in, (B, d, n_xdims), dtype=jnp.float32)
    A = 0.1 * jax.random.normal(k_a, (d, d), dtype=jnp.float32)   # plays the role of adj_A
    Wa = jax.random.normal(k_wa, (n_out,), dtype=jnp.float32)

    dims = [n_xdims] + hidden_layers + [n_out]
    wkeys = [k_w0, k_w1]
    bkeys = [k_b0, k_b1]
    weights = [_xavier_normal(wkeys[i], dims[i + 1], dims[i]) for i in range(len(dims) - 1)]
    # non-zero biases so the last-layer bias/Wa folding is fully exercised
    biases = [0.1 * jax.random.normal(bkeys[i], (dims[i + 1],), dtype=jnp.float32)
              for i in range(len(dims) - 1)]

    logits = mlp_encoder_forward(inputs, A, Wa, weights, biases)
    logits = jax.block_until_ready(logits)

    ref = _reference_forward(inputs, A, Wa, weights, biases)
    assert logits.shape == (B, d, n_out)
    assert jnp.allclose(logits, ref, atol=1e-4, rtol=1e-4), "mismatch vs reference"

    print("KERNEL_OK")
</pallas_src>

<mosaic_0001>
module attributes {stable_mosaic.version = 11 : i64} {
  func.func @kernel(%arg0: i32, %arg1: memref<4x256xf32, #tpu.memory_space<vmem>>, %arg2: memref<256x256xf32, #tpu.memory_space<vmem>>, %arg3: memref<4x256xf32, #tpu.memory_space<vmem>>, %arg4: memref<32x4xf32, #tpu.memory_space<vmem>>, %arg5: memref<32x1xf32, #tpu.memory_space<vmem>>, %arg6: memref<4x32xf32, #tpu.memory_space<vmem>>, %arg7: memref<4x256xf32, #tpu.memory_space<vmem>>) attributes {dimension_semantics = [#tpu.dimension_semantics<parallel>], iteration_bounds = array<i64: 2>, scalar_prefetch = 0 : i64, scratch_operands = 0 : i64, tpu.core_type = #tpu.core_type<tc>, window_params = [{transform_indices = @transform_0, window_bounds = array<i64: 4, 256>}, {pipeline_mode = #tpu.pipeline_mode<synchronous>, transform_indices = @transform_1, window_bounds = array<i64: 256, 256>}, {pipeline_mode = #tpu.pipeline_mode<synchronous>, transform_indices = @transform_2, window_bounds = array<i64: 4, 256>}, {pipeline_mode = #tpu.pipeline_mode<synchronous>, transform_indices = @transform_3, window_bounds = array<i64: 32, 4>}, {pipeline_mode = #tpu.pipeline_mode<synchronous>, transform_indices = @transform_4, window_bounds = array<i64: 32, 1>}, {pipeline_mode = #tpu.pipeline_mode<synchronous>, transform_indices = @transform_5, window_bounds = array<i64: 4, 32>}, {transform_indices = @transform_6, window_bounds = array<i64: 4, 256>}]} {
    %c0 = arith.constant 0 : index
    %c0_0 = arith.constant 0 : index
    %0 = vector.load %arg1[%c0, %c0_0] : memref<4x256xf32, #tpu.memory_space<vmem>>, vector<4x256xf32>
    %c0_1 = arith.constant 0 : index
    %c0_2 = arith.constant 0 : index
    %1 = vector.load %arg4[%c0_1, %c0_2] : memref<32x4xf32, #tpu.memory_space<vmem>>, vector<32x4xf32>
    %c0_3 = arith.constant 0 : index
    %c0_4 = arith.constant 0 : index
    %2 = vector.load %arg5[%c0_3, %c0_4] : memref<32x1xf32, #tpu.memory_space<vmem>>, vector<32x1xf32>
    %cst = arith.constant dense<0.000000e+00> : vector<32x256xf32>
    %3 = tpu.matmul %1, %0, %cst {dimension_numbers = #tpu.dot_dimension_numbers<[1], [0], [0], [1], [0, 0, 1, 1], [], []>} : vector<32x4xf32>, vector<4x256xf32>, vector<32x256xf32> -> vector<32x256xf32>
    %4 = vector.broadcast %2 : vector<32x1xf32> to vector<32x256xf32>
    %5 = arith.addf %3, %4 : vector<32x256xf32>
    %cst_5 = arith.constant 0.000000e+00 : f32
    %6 = vector.broadcast %cst_5 : f32 to vector<32x256xf32>
    %7 = arith.maximumf %5, %6 : vector<32x256xf32>
    %c0_6 = arith.constant 0 : index
    %c0_7 = arith.constant 0 : index
    %8 = vector.load %arg6[%c0_6, %c0_7] : memref<4x32xf32, #tpu.memory_space<vmem>>, vector<4x32xf32>
    %cst_8 = arith.constant dense<0.000000e+00> : vector<4x256xf32>
    %9 = tpu.matmul %8, %7, %cst_8 {dimension_numbers = #tpu.dot_dimension_numbers<[1], [0], [0], [1], [0, 0, 1, 1], [], []>} : vector<4x32xf32>, vector<32x256xf32>, vector<4x256xf32> -> vector<4x256xf32>
    %c0_9 = arith.constant 0 : index
    %c0_10 = arith.constant 0 : index
    %10 = vector.load %arg2[%c0_9, %c0_10] : memref<256x256xf32, #tpu.memory_space<vmem>>, vector<256x256xf32>
    %cst_11 = arith.constant dense<0.000000e+00> : vector<4x256xf32>
    %11 = tpu.matmul %9, %10, %cst_11 {dimension_numbers = #tpu.dot_dimension_numbers<[1], [0], [0], [1], [0, 0, 1, 1], [], []>} : vector<4x256xf32>, vector<256x256xf32>, vector<4x256xf32> -> vector<4x256xf32>
    %c0_12 = arith.constant 0 : index
    %c0_13 = arith.constant 0 : index
    %12 = vector.load %arg3[%c0_12, %c0_13] : memref<4x256xf32, #tpu.memory_space<vmem>>, vector<4x256xf32>
    %13 = arith.addf %11, %12 : vector<4x256xf32>
    %c0_14 = arith.constant 0 : index
    %c0_15 = arith.constant 0 : index
    %14 = vector.load %arg7[%c0_14, %c0_15] : memref<4x256xf32, #tpu.memory_space<vmem>>, vector<4x256xf32>
    tpu.vector_store %arg7[%c0_14, %c0_15], %13 {strides = array<i32>} : memref<4x256xf32, #tpu.memory_space<vmem>>, vector<4x256xf32>,
    return
  }
  func.func @transform_0(%arg0: i32) -> (i32, i32) {
    %c0_i32 = arith.constant 0 : i32
    %c0_i32_0 = arith.constant 0 : i32
    return %c0_i32, %arg0 : i32, i32
  }
  func.func @transform_1(%arg0: i32) -> (i32, i32) {
    %c0_i32 = arith.constant 0 : i32
    %c0_i32_0 = arith.constant 0 : i32
    %c0_i32_1 = arith.constant 0 : i32
    return %c0_i32, %c0_i32_0 : i32, i32
  }
  func.func @transform_2(%arg0: i32) -> (i32, i32) {
    %c0_i32 = arith.constant 0 : i32
    %c0_i32_0 = arith.constant 0 : i32
    %c0_i32_1 = arith.constant 0 : i32
    return %c0_i32, %c0_i32_0 : i32, i32
  }
  func.func @transform_3(%arg0: i32) -> (i32, i32) {
    %c0_i32 = arith.constant 0 : i32
    %c0_i32_0 = arith.constant 0 : i32
    %c0_i32_1 = arith.constant 0 : i32
    return %c0_i32, %c0_i32_0 : i32, i32
  }
  func.func @transform_4(%arg0: i32) -> (i32, i32) {
    %c0_i32 = arith.constant 0 : i32
    %c0_i32_0 = arith.constant 0 : i32
    %c0_i32_1 = arith.constant 0 : i32
    return %c0_i32, %c0_i32_0 : i32, i32
  }
  func.func @transform_5(%arg0: i32) -> (i32, i32) {
    %c0_i32 = arith.constant 0 : i32
    %c0_i32_0 = arith.constant 0 : i32
    %c0_i32_1 = arith.constant 0 : i32
    return %c0_i32, %c0_i32_0 : i32, i32
  }
  func.func @transform_6(%arg0: i32) -> (i32, i32) {
    %c0_i32 = arith.constant 0 : i32
    %c0_i32_0 = arith.constant 0 : i32
    return %c0_i32, %arg0 : i32, i32
  }
}

</mosaic_0001>

<bundles_post_ra>
// kernel: tpu_custom_call.1
= control target key start
LH: loop header
LB: loop body
LE: loop exit
PB: predicated region body
PF: predicated region fallthrough
CT: control target
= control target key end

     0   :  { %11 = vsyncpa [#allocation3], 0  ;;  %s1071_s0 = inlined_call_operand.vmem [shape: f32[4,512], index: 0, kind: input, shape index: {}]   ;;  %s1072_s1 = inlined_call_operand.hbm [shape: f32[256,256], index: 1, kind: input, shape index: {}]   ;;  %s1073_s2 = inlined_call_operand.vmem [shape: f32[4,256], index: 2, kind: input, shape index: {}]   ;;  %s1074_s3 = inlined_call_operand.vmem [shape: f32[32,4], index: 3, kind: input, shape index: {}]   ;;  %s1075_s4 = inlined_call_operand.vmem [shape: f32[32,1], index: 4, kind: input, shape index: {}]   ;;  %s1076_s5 = inlined_call_operand.vmem [shape: f32[4,32], index: 5, kind: input, shape index: {}]   ;;  %s1077_s6 = inlined_call_operand.hbm [shape: f32[4,512], index: 6, kind: output, shape index: {}]  }
   0x1   :  { %12 = vsyncpa [#allocation4], 0 }
   0x2   :  { %14 = vsyncpa [#allocation4 + $0x1], 0  ;;  %s933_s21 = smov 0   ;;  %s935_s22 = smov 0  }
   0x3   :  { %s937_s23 = smov 0   ;;  %s939_s24 = smov 0  }
   0x4 LB: > { %s954_s25 = sadd.s32 4294967295, %s890_s24   ;;  %s720_s26 = sadd.s32 4294967294, %s890_s24   ;;  %s890_s24 = sphi %s939_s24, %s1085_s24   ;;  %s886_s23 = sphi %s937_s23, %s1084_s23   ;;  %s882_s22 = sphi %s935_s22, %s1083_s22   ;;  %s878_s21 = sphi %s933_s21, %s1082_s21  }
   0x5   : > { %s958_s27 = sadd.s32 1, %s890_s24   ;;  %s158_s28 = sadd.s32 1, %s886_s23 }
   0x6   : > { %s155_s29 = ssub.s32 %s890_s24, %s958_s27  ;;  %p168_p0 = scmp.ne.s32.totalorder %s886_s23, %s882_s22 }
   0x7   : > { %p156_p1 = scmp.eq.s32.totalorder %s155_s29, 0  ;;  %p169_p2 = scmp.eq.s32.totalorder %s954_s25, 1 }
   0x8   : > { %p174_p3 = scmp.ne.s32.totalorder %s882_s22, %s878_s21  ;;  %p175_p4 = scmp.eq.s32.totalorder %s720_s26, 1 }
   0x9   : > { %s969_s30 = scalar_select %p156_p1, %s886_s23, %s158_s28  }
   0xa   : > { %p971_p5 = por %p169_p2, %p168_p0  ;;  %p975_p6 = por %p175_p4, %p174_p3 }
   0xb   : > { %p721_p7 = scmp.ge.s32.totalorder %s890_s24, 1  ;;  %p182_p8 = scmp.lt.s32.totalorder %s890_s24, 3 }
   0xc   : > { %s1079_s8 = scalar_select %p975_p6, 1, 0 }
   0xd   : > { %p756_p9 = scmp.eq.s32.totalorder %s954_s25, 0  ;;  %p982_p10 = pnand %p721_p7, %p182_p8 }
   0xe   : > { %s892_s10 = smov [#allocation2]  }
   0xf   : > { %s194_s11 = sshll.u32 %s892_s10, 4  ;;  %p748_p11 = pneg %p982_p10  ;;  %s195_s11 = int_to_ptr.vmem [resolvable:$true] %s194_s11 }
  0x10   : > { %s811_s12 = scalar_lea.vmem %s195_s11, 8192  ;;  %p819_p3 = scmp.lt.s32.totalorder %s195_s11, %s195_s11 }
  0x11   : > { %p749_p12 = pnand %p756_p9, %p748_p11  ;;  %p812_p0 = scmp.ne.s32.totalorder %s195_s11, %s811_s12 }
  0x12   : > { %p820_p4 = scmp.lt.s32.totalorder %s811_s12, %s811_s12 }
  0x13   : > { %p802_p13 = pneg %p749_p12 }
  0x14   : > { %p821_p6 = por %p820_p4, %p819_p3 }
  0x15   : > { %p814_p1 = pnand %p812_p0, %p802_p13 }
  0x17   : > { %p815_p2 = pneg %p814_p1 }
  0x19   : > { %p822_p7 = pnand %p821_p6, %p815_p2 }
  0x1b   : > { %825 = shalt.err (!%p822_p7)
}
  0x1c   : > { %s893_s13 = smov 256   ;;  %s894_s14 = smov 16  }
  0x1d   : > { %751 = dma.hbm_to_vmem [thread:$0]  (!%p749_p12), %s1072_s1, 8192, %s195_s11, [#allocation3], %s893_s13, %s893_s13, %s894_s14  }
  0x1e   : > { %231 = sbr.rel (%p982_p10) target bundleno = 674 (0x2a2), region = 44 }
  0x23   : > { %869 = dma.done.wait (%p756_p9), [#allocation3], 8192  }
  0x24   : > { %871 = vsyncadd (%p756_p9), [#allocation3], 4294959104  ;;  %s727_s17 = sshll.u32 %s954_s25, 1  ;;  %v895_v0 = vmov 0.0   ;;  %v896_v1 = vmov 0   ;;  %vm312_vm0 = vcmask 1043456  }
  0x25   : > { %p262_p8 = scmp.lt.s32.totalorder %s727_s17, 3  ;;  %381 = vmatprep.mubr.f32.mxu1 %v895_v0  ;;  %797 = vset.pattern.permute.xlu1 %v896_v1  ;;  %v274_v4 = vld [vmem:[%s1075_s4 + $0x8] sm:$0xff]  ;;  %v269_v5 = vld [vmem:[%s1074_s3] sm:$0xff]  ;;  %vm299_vm1 = vcmask 31744   ;;  %v276_v6 = vld [vmem:[%s1075_s4 + $0x18] sm:$0xff]  ;;  %vm415_vm2 = vcmask 261120  }
  0x26   : > { %796 = vset.pattern.permute.xlu0 %v896_v1  ;;  %284 = vperm.xlu1 %797, %v274_v4   ;;  %v273_v7 = vld [vmem:[%s1075_s4] sm:$0xff]  ;;  %v275_v8 = vld [vmem:[%s1075_s4 + $0x10] sm:$0xff]  ;;  %v270_v9 = vld [vmem:[%s1074_s3 + $0x8] sm:$0xff]  ;;  %s258_s10 = sand.u32 1, %s882_s22   ;;  %s741_s14 = sshll.u32 %s954_s25, 7 }
  0x27   : > { %s1087_s17 = smov (!%p262_p8, %s727_s17), 3  ;;  %294 = vperm.xlu0 %796, %v276_v6   ;;  %v271_v10 = vld [vmem:[%s1074_s3 + $0x10] sm:$0xff]  ;;  %v272_v11 = vld [vmem:[%s1074_s3 + $0x18] sm:$0xff]  ;;  %v519_v14 = vld [vmem:[#allocation2 + $0xe8] sm:$0xff]  ;;  %s726_s13 = sshll.u32 %s258_s10, 3 }
  0x28   : > { %s728_s18 = sshll.u32 %s1087_s17, 2  ;;  %v521_v12 = vld [vmem:[#allocation2 + $0xf8] sm:$0xff]  ;;  %v520_v13 = vld [vmem:[#allocation2 + $0xf0] sm:$0xff]  ;;  %v518_v15 = vld [vmem:[#allocation2 + $0xe0] sm:$0xff]  ;;  %s260_s15 = scalar_lea.vmem [#allocation5], %s726_s13 }
  0x29   : > { %s265_s26 = scalar_lea.vmem %s1071_s0, %s728_s18  ;;  %558 = vmatprep.subr.mxu0 %v521_v12  ;;  %v517_v16 = vld [vmem:[#allocation2 + $0xd8] sm:$0xff]  ;;  %v516_v17 = vld [vmem:[#allocation2 + $0xd0] sm:$0xff]  ;;  %v515_v18 = vld [vmem:[#allocation2 + $0xc8] sm:$0xff]  ;;  %s649_s16 = sshll.u32 %s260_s15, 4  ;;  %s650_s16 = int_to_ptr.vmem [resolvable:$true] %s649_s16 }
  0x2a   : > { %v268_v2 = vld [vmem:[%s265_s26] sm:$0xff]  ;;  %279 = vperm.xlu1 %797, %v273_v7   ;;  %559 = vmatpush1.msra.mxu0 %v520_v13  ;;  %v513_v20 = vld [vmem:[#allocation2 + $0xb8] sm:$0xff]  ;;  %v512_v21 = vld [vmem:[#allocation2 + $0xb0] sm:$0xff]  ;;  %s647_s19 = scalar_lea.hbm %s1077_s6, %s741_s14  ;;  %s635_s20 = scalar_lea.sflag [#allocation4], %s258_s10 }
  0x2b   : > { %v298_v3 = vcombine.high %v268_v2, %v268_v2  ;;  %289 = vperm.xlu0 %796, %v275_v8   ;;  %560 = vmatprep.subr.mxu0 %v519_v14  ;;  %v514_v19 = vld [vmem:[#allocation2 + $0xc0] sm:$0xff]  ;;  %v511_v22 = vld [vmem:[#allocation2 + $0xa8] sm:$0xff]  ;;  %v509_v24 = vld [vmem:[#allocation2 + $0x98] sm:$0xff]  ;;  %s826_s26 = scalar_lea.vmem %s650_s16, 128  ;;  %s897_s28 = smov [#allocation5]  }
  0x2c   : > { %561 = vmatpush1.msra.mxu0 %v518_v15  ;;  %v510_v23 = vld [vmem:[#allocation2 + $0xa0] sm:$0xff]  ;;  %v508_v25 = vld [vmem:[#allocation2 + $0x90] sm:$0xff]  ;;  %v507_v26 = vld [vmem:[#allocation2 + $0x88] sm:$0xff]  ;;  %p827_p6 = scmp.ne.s32.totalorder %s650_s16, %s826_s26  ;;  %s830_s29 = sshll.u32 %s897_s28, 4  ;;  %s831_s29 = int_to_ptr.vmem [resolvable:$false] %s830_s29 }
  0x2d   : > { %729 = vmatprep.subr.msk.mxu1 %vm312_vm0, %v298_v3  ;;  %562 = vmatprep.subr.mxu0 %v517_v16  ;;  %v506_v27 = vld [vmem:[#allocation2 + $0x80] sm:$0xff]  ;;  %v505_v28 = vld [vmem:[#allocation2 + $0x78] sm:$0xff]  ;;  %v504_v29 = vld [vmem:[#allocation2 + $0x70] sm:$0xff]  ;;  %s832_s25 = scalar_lea.vmem %s831_s29, 256  ;;  %p833_p11 = scmp.lt.s32.totalorder %s650_s16, %s831_s29 }
  0x2e   : > { %730 = vmatpush1.msk.msra.mxu1 %vm312_vm0, %v268_v2  ;;  %563 = vmatpush1.msra.mxu0 %v516_v17  ;;  %v503_v30 = vld [vmem:[#allocation2 + $0x68] sm:$0xff]  ;;  %v502_v31 = vld [vmem:[#allocation2 + $0x60] sm:$0xff]  ;;  %v501_v32 = vld [vmem:[#allocation2 + $0x58] sm:$0xff]  ;;  %p828_p9 = pnand %p827_p6, %p971_p5  ;;  %p834_p12 = scmp.lt.s32.totalorder %s832_s25, %s826_s26 }
  0x2f   : > { %731 = vmatmul.mubr.msk.f32.vlgmr.msra.gmra.mxu1 %vm299_vm1, %v269_v5  ;;  %564 = vmatprep.subr.mxu0 %v515_v18  ;;  %v500_v33 = vld [vmem:[#allocation2 + $0x50] sm:$0xff]  ;;  %v499_v34 = vld [vmem:[#allocation2 + $0x48] sm:$0xff]  ;;  %v498_v35 = vld [vmem:[#allocation2 + $0x40] sm:$0xff] }
  0x30   : > { %387 = vmatprep.mubr.f32.mxu1 %v895_v0  ;;  %565 = vmatpush1.msra.mxu0 %v514_v19  ;;  %v497_v36 = vld [vmem:[#allocation2 + $0x38] sm:$0xff]  ;;  %v496_v37 = vld [vmem:[#allocation2 + $0x30] sm:$0xff]  ;;  %v495_v38 = vld [vmem:[#allocation2 + $0x28] sm:$0xff]  ;;  %p829_p10 = pneg %p828_p9  ;;  %p835_p13 = por %p834_p12, %p833_p11 }
  0x31   : > { %566 = vmatprep.subr.mxu0 %v513_v20  ;;  %v494_v39 = vld [vmem:[#allocation2 + $0x20] sm:$0xff]  ;;  %v493_v40 = vld [vmem:[#allocation2 + $0x18] sm:$0xff]  ;;  %v492_v41 = vld [vmem:[#allocation2 + $0x10] sm:$0xff] }
  0x32   : > { %567 = vmatpush1.msra.mxu0 %v512_v21  ;;  %v491_v42 = vld [vmem:[#allocation2 + $0x8] sm:$0xff]  ;;  %v490_v43 = vld [vmem:[#allocation2] sm:$0xff]  ;;  %v553_v44 = vld [vmem:[#allocation2 + $0x1f8] sm:$0xff]  ;;  %p836_p0 = pnand %p835_p13, %p829_p10 }
  0x33   : > { %732 = vmatmul.mubr.msk.f32.gmra.mxu1 %vm299_vm1, %v270_v9  ;;  %568 = vmatprep.subr.mxu0 %v511_v22  ;;  %v552_v45 = vld [vmem:[#allocation2 + $0x1f0] sm:$0xff]  ;;  %v551_v46 = vld [vmem:[#allocation2 + $0x1e8] sm:$0xff]  ;;  %v550_v47 = vld [vmem:[#allocation2 + $0x1e0] sm:$0xff] }
  0x34   : > { %393 = vmatprep.mubr.f32.mxu1 %v895_v0  ;;  %569 = vmatpush1.msra.mxu0 %v510_v23  ;;  %v549_v48 = vld [vmem:[#allocation2 + $0x1d8] sm:$0xff]  ;;  %v548_v49 = vld [vmem:[#allocation2 + $0x1d0] sm:$0xff]  ;;  %v547_v50 = vld [vmem:[#allocation2 + $0x1c8] sm:$0xff] }
  0x35   : > { %570 = vmatprep.subr.mxu0 %v509_v24  ;;  %v546_v51 = vld [vmem:[#allocation2 + $0x1c0] sm:$0xff]  ;;  %v545_v52 = vld [vmem:[#allocation2 + $0x1b8] sm:$0xff]  ;;  %v544_v53 = vld [vmem:[#allocation2 + $0x1b0] sm:$0xff] }
  0x36   : > { %571 = vmatpush1.msra.mxu0 %v508_v25  ;;  %v543_v54 = vld [vmem:[#allocation2 + $0x1a8] sm:$0xff]  ;;  %v542_v55 = vld [vmem:[#allocation2 + $0x1a0] sm:$0xff]  ;;  %v541_v56 = vld [vmem:[#allocation2 + $0x198] sm:$0xff] }
  0x37   : > { %733 = vmatmul.mubr.msk.f32.gmra.mxu1 %vm299_vm1, %v271_v10  ;;  %572 = vmatprep.subr.mxu0 %v507_v26  ;;  %v540_v57 = vld [vmem:[#allocation2 + $0x190] sm:$0xff]  ;;  %v539_v58 = vld [vmem:[#allocation2 + $0x188] sm:$0xff]  ;;  %v538_v59 = vld [vmem:[#allocation2 + $0x180] sm:$0xff] }
  0x38   : > { %399 = vmatprep.mubr.f32.mxu1 %v895_v0  ;;  %573 = vmatpush1.msra.mxu0 %v506_v27  ;;  %v537_v60 = vld [vmem:[#allocation2 + $0x178] sm:$0xff]  ;;  %v536_v61 = vld [vmem:[#allocation2 + $0x170] sm:$0xff]  ;;  %v535_v62 = vld [vmem:[#allocation2 + $0x168] sm:$0xff] }
  0x39   : > { %574 = vmatprep.subr.mxu0 %v505_v28  ;;  %v534_v63 = vld [vmem:[#allocation2 + $0x160] sm:$0xff]  ;;  %v532_v1 = vld [vmem:[#allocation2 + $0x150] sm:$0xff]  ;;  %v531_v2 = vld [vmem:[#allocation2 + $0x148] sm:$0xff] }
  0x3a   : > { %575 = vmatpush1.msra.mxu0 %v504_v29  ;;  %v530_v3 = vld [vmem:[#allocation2 + $0x140] sm:$0xff]  ;;  %v529_v4 = vld [vmem:[#allocation2 + $0x138] sm:$0xff]  ;;  %v528_v5 = vld [vmem:[#allocation2 + $0x130] sm:$0xff] }
  0x3b   : > { %734 = vmatmul.mubr.msk.f32.gmra.mxu1 %vm299_vm1, %v272_v11  ;;  %576 = vmatprep.subr.mxu0 %v503_v30  ;;  %v527_v6 = vld [vmem:[#allocation2 + $0x128] sm:$0xff]  ;;  %v526_v7 = vld [vmem:[#allocation2 + $0x120] sm:$0xff] }
  0x3c   : > { %483 = vmatprep.mubr.f32.mxu1 %v895_v0  ;;  %577 = vmatpush1.msra.mxu0 %v502_v31  ;;  %v533_v0 = vld [vmem:[#allocation2 + $0x158] sm:$0xff] }
  0x3d   : > { %578 = vmatprep.subr.mxu0 %v501_v32 }
  0x3e   : > { %579 = vmatpush1.msra.mxu0 %v500_v33 }
  0x3f   : > { %580 = vmatprep.subr.mxu0 %v499_v34 }
  0x40   : > { %581 = vmatpush1.msra.mxu0 %v498_v35 }
  0x41   : > { %582 = vmatprep.subr.mxu0 %v497_v36  ;;  %v414_v36 = vld [vmem:[%s1076_s5] sm:$0xf] }
  0x42   : > { %583 = vmatpush1.msra.mxu0 %v496_v37  ;;  %v525_v37 = vld [vmem:[#allocation2 + $0x118] sm:$0xff] }
  0x43   : > { %584 = vmatprep.subr.mxu0 %v495_v38  ;;  %v524_v38 = vld [vmem:[#allocation2 + $0x110] sm:$0xff] }
  0x44   : > { %585 = vmatpush1.msra.mxu0 %v494_v39  ;;  %v523_v39 = vld [vmem:[#allocation2 + $0x108] sm:$0xff] }
  0x45   : > { %586 = vmatprep.subr.mxu0 %v493_v40  ;;  %v522_v40 = vld [vmem:[#allocation2 + $0x100] sm:$0xff] }
  0x46   : > { %587 = vmatpush1.msra.mxu0 %v492_v41 }
  0x47   : > { %588 = vmatprep.subr.mxu0 %v491_v42 }
  0x48   : > { %589 = vmatpush1.msra.mxu0 %v490_v43  ;;  %v554_v43 = vld [vmem:[%s1073_s2] sm:$0xff] }
  0x49   : > { %590 = vmatprep.subr.mxu0 %v553_v44  ;;  %v556_v44 = vcombine.high %v554_v43, %v554_v43 }
  0x4a   : > { %591 = vmatpush2.msra.mxu0 %v552_v45 }
  0x4b   : > { %592 = vmatprep.subr.mxu0 %v551_v46 }
  0x4c   : > { %593 = vmatpush2.msra.mxu0 %v550_v47 }
  0x4d   : > { %594 = vmatprep.subr.mxu0 %v549_v48 }
  0x4e   : > { %595 = vmatpush2.msra.mxu0 %v548_v49 }
  0x4f   : > { %596 = vmatprep.subr.mxu0 %v547_v50 }
  0x50   : > { %597 = vmatpush2.msra.mxu0 %v546_v51 }
  0x51   : > { %598 = vmatprep.subr.mxu0 %v545_v52 }
  0x52   : > { %599 = vmatpush2.msra.mxu0 %v544_v53 }
  0x53   : > { %600 = vmatprep.subr.mxu0 %v543_v54 }
  0x54   : > { %601 = vmatpush2.msra.mxu0 %v542_v55 }
  0x55   : > { %602 = vmatprep.subr.mxu0 %v541_v56 }
  0x56   : > { %603 = vmatpush2.msra.mxu0 %v540_v57 }
  0x57   : > { %604 = vmatprep.subr.mxu0 %v539_v58 }
  0x58   : > { %605 = vmatpush2.msra.mxu0 %v538_v59 }
  0x59   : > { %606 = vmatprep.subr.mxu0 %v537_v60 }
  0x5a   : > { %607 = vmatpush2.msra.mxu0 %v536_v61 }
  0x5b   : > { %608 = vmatprep.subr.mxu0 %v535_v62 }
  0x5c   : > { %609 = vmatpush2.msra.mxu0 %v534_v63 }
  0x5d   : > { %610 = vmatprep.subr.mxu0 %v533_v0 }
  0x5e   : > { %611 = vmatpush2.msra.mxu0 %v532_v1 }
  0x5f   : > { %612 = vmatprep.subr.mxu0 %v531_v2 }
  0x60   : > { %613 = vmatpush2.msra.mxu0 %v530_v3 }
  0x61   : > { %614 = vmatprep.subr.mxu0 %v529_v4 }
  0x62   : > { %615 = vmatpush2.msra.mxu0 %v528_v5 }
  0x63   : > { %616 = vmatprep.subr.mxu0 %v527_v6 }
  0x64   : > { %617 = vmatpush2.msra.mxu0 %v526_v7 }
  0x65   : > { %618 = vmatprep.subr.mxu0 %v525_v37 }
  0x66   : > { %619 = vmatpush2.msra.mxu0 %v524_v38 }
  0x67   : > { %620 = vmatprep.subr.mxu0 %v523_v39 }
  0x68   : > { %621 = vmatpush2.msra.mxu0 %v522_v40 }
  0xa1   : > { %v285_v15 = vpop.permute.xlu1 %284 }
  0xa2   : > { %v295_v12 = vpop.permute.xlu0 %294 }
  0xa5   : > { %v280_v23 = vpop.permute.xlu1 %279 }
  0xa6   : > { %v290_v17 = vpop.permute.xlu0 %289 }
  0xef   : > { %v383_v8 = vpop.f32.mrf.mxu1 }
  0xf0   : > { %v384_v30 = vadd.f32 %v383_v8, %v280_v23 }
  0xf1   : > { %v385_v9 = vpop.f32.mrf.mxu1 }
  0xf2   : > { %v386_v28 = vadd.f32 %v385_v9, %v280_v23  ;;  %v406_v35 = vmax.f32 %v384_v30, 0.0 }
  0xf3   : > { %v389_v10 = vpop.f32.mrf.mxu1 }
  0xf4   : > { %v390_v26 = vadd.f32 %v389_v10, %v285_v15  ;;  %v407_v34 = vmax.f32 %v386_v28, 0.0 }
  0xf5   : > { %v391_v11 = vpop.f32.mrf.mxu1 }
  0xf6   : > { %v392_v24 = vadd.f32 %v391_v11, %v285_v15  ;;  %v408_v33 = vmax.f32 %v390_v26, 0.0 }
  0xf7   : > { %v395_v13 = vpop.f32.mrf.mxu1 }
  0xf8   : > { %v396_v22 = vadd.f32 %v395_v13, %v290_v17  ;;  %v409_v32 = vmax.f32 %v392_v24, 0.0 }
  0xf9   : > { %v397_v14 = vpop.f32.mrf.mxu1 }
  0xfa   : > { %v398_v20 = vadd.f32 %v397_v14, %v290_v17  ;;  %v410_v31 = vmax.f32 %v396_v22, 0.0 }
  0xfb   : > { %v401_v16 = vpop.f32.mrf.mxu1 }
  0xfc   : > { %v402_v18 = vadd.f32 %v401_v16, %v295_v12  ;;  %v411_v29 = vmax.f32 %v398_v20, 0.0 }
  0xfd   : > { %v403_v19 = vpop.f32.mrf.mxu1 }
  0xfe   : > { %v404_v21 = vadd.f32 %v403_v19, %v295_v12  ;;  %v412_v27 = vmax.f32 %v402_v18, 0.0 }
 0x100   : > { %v413_v25 = vmax.f32 %v404_v21, 0.0 }
 0x102   : > { %443 = vmatprep.subr.mxu1 %v413_v25 }
 0x103   : > { %444 = vmatpush1.msra.mxu1 %v412_v27 }
 0x104   : > { %445 = vmatprep.subr.mxu1 %v411_v29 }
 0x105   : > { %446 = vmatpush1.msra.mxu1 %v410_v31 }
 0x106   : > { %447 = vmatprep.subr.mxu1 %v409_v32 }
 0x107   : > { %448 = vmatpush1.msra.mxu1 %v408_v33 }
 0x108   : > { %449 = vmatprep.subr.mxu1 %v407_v34 }
 0x109   : > { %450 = vmatpush1.msra.mxu1 %v406_v35 }
 0x10a   : > { %735 = vmatmul.mubr.msk.f32.vlgmr.msra.gmra.mxu1 %vm415_vm2, %v414_v36 }
 0x1ca   : > { %v485_v41 = vpop.f32.mrf.mxu1 }
 0x1cc   : > { %v487_v42 = vpop.f32.mrf.mxu1 }
 0x1cd   : > { %622 = vmatprep.mubr.f32.mxu0 %v487_v42 }
 0x1ce   : > { %623 = vmatmul.mubr.f32.vlgmr.msra.gmra.mxu0 %v485_v41 }
 0x28e   : > { %v624_v45 = vpop.f32.mrf.mxu0 }
 0x28f   : > { %v625_v47 = vadd.f32 %v624_v45, %v554_v43 }
 0x290   : > { %v626_v46 = vpop.f32.mrf.mxu0 }
 0x291   : > { %v627_v48 = vadd.f32 %v626_v46, %v556_v44 }
 0x293   : > { %v631_v49 = vcombine.low %v625_v47, %v627_v48 }
 0x295   : > { %633 = vst [vmem:[%s260_s15] sm:$0xff] %v631_v49 }
 0x296   : > { %839 = shalt.err (!%p836_p0)
}
 0x297   : > { %s840_s9 = scalar_lea.hbm %s647_s19, 128  ;;  %s844_s12 = scalar_lea.hbm %s1077_s6, 256 }
 0x298   : > { %p841_p1 = scmp.ne.s32.totalorder %s647_s19, %s840_s9  ;;  %p845_p4 = scmp.lt.s32.totalorder %s647_s19, %s1077_s6 }
 0x299   : > { %p846_p7 = scmp.lt.s32.totalorder %s844_s12, %s840_s9 }
 0x29a   : > { %p842_p2 = pnand %p841_p1, %p971_p5 }
 0x29b   : > { %p847_p8 = por %p846_p7, %p845_p4 }
 0x29c   : > { %p843_p3 = pneg %p842_p2 }
 0x29e   : > { %p848_p6 = pnand %p847_p8, %p843_p3 }
 0x2a0   : > { %851 = shalt.err (!%p848_p6)
}
 0x2a1   : > { %746 = dma.vmem_to_hbm [thread:$0]  (%p971_p5), %s650_s16, 128, %s647_s19, %s635_s20  }
 0x2a2 PF: > { %p758_p9 = scmp.ge.s32.totalorder %s890_s24, 2  ;;  %s661_s15 = sand.u32 1, %s878_s21  }
 0x2a3   : > { %p1081_p10 = scmp.ne.s32.totalorder %s1079_s8, 0  ;;  %s662_s17 = scalar_lea.sflag [#allocation4], %s661_s15 }
 0x2a5   : > { %p753_p11 = pnand %p758_p9, %p1081_p10 }
 0x2a7   : > { %p754_p12 = pneg %p753_p11 }
 0x2a9   : > { %873 = dma.done.wait (%p754_p12), %s662_s17, 128  }
 0x2aa   : > { %875 = vsyncadd (%p754_p12), %s662_s17, 4294967168  ;;  %p17_p13 = scmp.ge.s32.totalorder %s958_s27, 4   ;;  %s1082_s21 = smov %s882_s22 }
 0x2ab   : > { %s1083_s22 = smov %s886_s23  ;;  %s1084_s23 = smov %s969_s30 }
 0x2ac   : > { %s1085_s24 = smov %s958_s27  ;;  %19 = sbr.rel (!%p17_p13) target bundleno = 4 (0x4), region = 84 }
 0x2b1   :  { %667 = vsyncpa [#allocation3], 1 }
 0x2b2   :  { %669 = vsyncpa [#allocation3 + $0x1], 1 }
 0x2b3   :  { %670 = vsyncpa [#allocation4], 1 }
 0x2b4   :  { %672 = vsyncpa [#allocation4 + $0x1], 1 }

</bundles_post_ra>
